<compile_context>
chip_gen: v6e
topology: v6e:2x2x1
jax: 0.10.0
libtpu: 0.0.40
codegen_flags: <defaults>
</compile_context>

<pallas_src>
import functools

import jax
import jax.numpy as jnp
from jax.experimental import pallas as pl
from jax.experimental.pallas import tpu as pltpu

NUM_VIEWS = 4        # VIEWS.LIST = [L_CC, R_CC, L_MLO, R_MLO]
FEAT_DIM = 256       # channels of the per-view feature maps / fc hidden width
LANES = 128
SUBLANES = 8


def _risk_head_kernel(feats_ref, w1_ref, b1_ref, w2_ref, b2_ref, out_ref,
                      acc_ref, *, inv_hw, n_slabs):
    """Grid = (view, batch_tile, hw_tile); hw_tile is the reduction axis.

    feats_ref: (1, TB, C, THW) block, backbone-native NCHW layout (C on sublanes,
               HW on lanes).
    w1_ref:    (1, C, C)   torch fc1 weight, stored transposed as [in, out]
    b1_ref:    (1, 1, C)
    w2_ref:    (1, 1, C)   torch fc2 weight of shape (1, 256)
    b2_ref:    (1, 1, 1)
    out_ref:   (1, TB, 1)  per-view sigmoid scores
    acc_ref:   VMEM (TB, C, 128) f32 lane-shaped spatial-sum accumulator
    """
    hw = pl.program_id(2)
    f = feats_ref[0]                                           # (TB, C, THW)

    # Lane-aligned slab accumulation: pure VPU adds over 128-lane slabs of this
    # block.  No cross-lane (XLU) work and no relayout while feats stream in.
    partial = f[:, :, 0:LANES].astype(jnp.float32)
    for j in range(1, n_slabs):
        partial = partial + f[:, :, j * LANES:(j + 1) * LANES].astype(jnp.float32)

    @pl.when(hw == 0)
    def _init():
        acc_ref[...] = partial

    @pl.when(hw > 0)
    def _accum():
        acc_ref[...] += partial

    @pl.when(hw == pl.num_programs(2) - 1)
    def _finalize():
        # One XLU lane-reduce + sublane->lane relayout per (view, batch-tile).
        # Divide by the TRUE H*W; zero padding contributes nothing to the sum,
        # so the average pool is exact.
        h = jnp.sum(acc_ref[...], axis=-1) * inv_hw            # (TB, 256), C on lanes
        # fc1 (256 -> 256) on the MXU + bias + ReLU
        h1 = jnp.dot(h, w1_ref[0], preferred_element_type=jnp.float32) + b1_ref[0]
        h1 = jnp.maximum(h1, 0.0)
        # fc2 (256 -> 1): elementwise mul + lane reduce, then sigmoid
        logit = jnp.sum(h1 * w2_ref[0], axis=-1, keepdims=True) + b2_ref[0]   # (TB, 1)
        out_ref[0] = jax.nn.sigmoid(logit).astype(out_ref.dtype)


def _vmem_capacity_bytes():
    """Physical VMEM of the current generation; conservative (v7x) fallback."""
    try:
        cap = int(pltpu.get_tpu_info().vmem_capacity_bytes)
        if cap > 0:
            return cap
    except Exception:
        pass
    return 64 * 2**20     # v7x per-TensorCore VMEM: the most restrictive generation


def _batch_tiling(B):
    """Returns (padded batch, descending batch-tile candidates)."""
    if B <= SUBLANES:
        return B, [B]                       # full batch as the tile (block dim = full)
    b_pad = -(-B // SUBLANES) * SUBLANES    # pad to a sublane multiple
    cands = [t for t in (64, 56, 48, 40, 32, 24, 16, 8)
             if t <= b_pad and b_pad % t == 0]
    return b_pad, cands


def _choose_tiles(tb_cands, hw_pad, itemsize, budget):
    """Jointly pick (TB, THW) so double-buffered feats + weights + acc fit `budget`.

    THW (lanes) is grown before TB: it gives longer contiguous DMA runs and does
    not enlarge the accumulator.  TB is capped at 64 (fc head FLOPs are negligible).
    """
    C = FEAT_DIM
    head_bytes = 2 * (C * C + 2 * C + 1) * 4        # double-buffered per-view params
    max_block = 16 * 2**20                          # bound unrolled slab-loop size
    thw_cands = [t for t in (hw_pad, 4096, 2048, 1024, 512, 256, 128)
                 if t <= min(hw_pad, 4096) and hw_pad % t == 0]
    seen = set()
    thw_cands = [t for t in thw_cands if not (t in seen or seen.add(t))]

    fallback = None
    for thw in thw_cands:                 # prefer big THW
        for tb in tb_cands:               # then big TB (amortize per-step overhead)
            feat_block = tb * C * thw * itemsize
            acc_bytes = tb * C * LANES * 4
            out_bytes = 2 * tb * LANES * 4
            need = 2 * feat_block + head_bytes + acc_bytes + out_bytes
            if fallback is None or need < fallback[2]:
                fallback = (tb, thw, need)
            if feat_block <= max_block and need <= budget:
                return tb, thw, need
    return fallback                        # smallest footprint if nothing fit


def image_wise_risk_forward(feat_maps_nchw, params):
    """feat_maps_nchw: [V, B, C, H, W] stacked per-view feature maps (torch NCHW).

    Feed bf16 feature maps when the backbone epilogue allows it: the kernel is
    HBM-bound on this stream and accumulates in f32 regardless of input dtype.
    """
    V, B, C, H, W = feat_maps_nchw.shape
    assert V == NUM_VIEWS and C == FEAT_DIM
    HW = H * W
    hw_pad = -(-HW // LANES) * LANES
    b_pad, tb_cands = _batch_tiling(B)

    # Free contiguous reshape (no NCHW->NHWC transpose); zero-pad the spatial axis
    # to a lane multiple and (for B > 8) the batch axis to a sublane multiple.
    feats = feat_maps_nchw.reshape(V, B, C, HW)
    if b_pad != B or hw_pad != HW:
        feats = jnp.pad(feats, ((0, 0), (0, b_pad - B), (0, 0), (0, hw_pad - HW)))
    w1, b1, w2, b2 = params

    itemsize = feats.dtype.itemsize
    vmem_cap = _vmem_capacity_bytes()
    budget = min(int(vmem_cap * 0.7), 96 * 2**20)
    TB, THW, need = _choose_tiles(tb_cands, hw_pad, itemsize, budget)
    n_b, n_hw = b_pad // TB, hw_pad // THW

    kernel = functools.partial(
        _risk_head_kernel,
        inv_hw=1.0 / float(HW),          # TRUE H*W, not the padded extent
        n_slabs=THW // LANES,
    )

    # Never ask Mosaic for more than ~90% of physical VMEM (v7x is 64 MiB/TC).
    vmem_limit = int(min(int(vmem_cap * 0.9), 112 * 2**20,
                         max(32 * 2**20, need + 8 * 2**20)))

    cost = pl.CostEstimate(
        flops=int(V * b_pad * (C * hw_pad + 2 * C * C + 2 * C)),
        transcendentals=int(V * b_pad),
        bytes_accessed=int(feats.size * itemsize
                           + sum(int(p.size) * p.dtype.itemsize for p in params)
                           + V * b_pad * 4),
    )

    scores = pl.pallas_call(
        kernel,
        out_shape=jax.ShapeDtypeStruct((V, b_pad, 1), jnp.float32),
        grid_spec=pltpu.PrefetchScalarGridSpec(
            num_scalar_prefetch=0,
            grid=(V, n_b, n_hw),
            in_specs=[
                pl.BlockSpec((1, TB, C, THW), lambda v, b, hw: (v, b, 0, hw)),
                pl.BlockSpec((1, C, C), lambda v, b, hw: (v, 0, 0)),
                pl.BlockSpec((1, 1, C), lambda v, b, hw: (v, 0, 0)),
                pl.BlockSpec((1, 1, C), lambda v, b, hw: (v, 0, 0)),
                pl.BlockSpec((1, 1, 1), lambda v, b, hw: (v, 0, 0)),
            ],
            out_specs=pl.BlockSpec((1, TB, 1), lambda v, b, hw: (v, b, 0)),
            scratch_shapes=[pltpu.VMEM((TB, C, LANES), jnp.float32)],
        ),
        compiler_params=pltpu.CompilerParams(
            dimension_semantics=("parallel", "parallel", "arbitrary"),
            vmem_limit_bytes=vmem_limit,
        ),
        cost_estimate=cost,
    )(feats, w1, b1, w2, b2)

    # torch: cat over the 4 per-view sigmoids then .mean(1) == mean over view axis.
    return jnp.mean(scores[:, :B, 0], axis=0)               # [B]


def init_params(key):
    """Deterministic synthetic weights for the 4 per-view heads."""
    k1, k2, k3, k4 = jax.random.split(key, 4)
    scale = 1.0 / jnp.sqrt(jnp.float32(FEAT_DIM))
    # fc1_{l_cc, r_cc, l_mlo, r_mlo}: torch weight (256,256); stored transposed [in,out]
    w1 = jax.random.normal(k1, (NUM_VIEWS, FEAT_DIM, FEAT_DIM), jnp.float32) * scale
    b1 = jax.random.normal(k2, (NUM_VIEWS, 1, FEAT_DIM), jnp.float32) * 0.01
    # fc2_{...}: torch weight (1, 256), bias (1,)
    w2 = jax.random.normal(k3, (NUM_VIEWS, 1, FEAT_DIM), jnp.float32) * scale
    b2 = jax.random.normal(k4, (NUM_VIEWS, 1, 1), jnp.float32) * 0.01
    return w1, b1, w2, b2


def reference_forward(feat_maps_nchw, params):
    """Pure-JAX reference mirroring the PyTorch forward (batch_norm/dropout off)."""
    w1, b1, w2, b2 = params
    h = jnp.mean(feat_maps_nchw.astype(jnp.float32), axis=(3, 4))   # [V, B, C]
    ys = []
    for v in range(NUM_VIEWS):
        hv = jnp.maximum(h[v] @ w1[v] + b1[v], 0.0)                 # [B, 256]
        logit = hv @ w2[v].T + b2[v]                                # [B, 1]
        ys.append(jax.nn.sigmoid(logit))
    return jnp.concatenate(ys, axis=1).mean(axis=1)                 # [B]


if __name__ == "__main__":
    key = jax.random.PRNGKey(0)
    k_feat, k_par = jax.random.split(key)

    # Small shapes: batch=2, 4 views, 256-channel feature maps with 8x8 spatial.
    # The backbone epilogue would emit bf16; stream that dtype straight through.
    B, H, W = 2, 8, 8
    feat_maps = jax.random.normal(
        k_feat, (NUM_VIEWS, B, FEAT_DIM, H, W), jnp.float32
    ).astype(jnp.bfloat16)
    params = init_params(k_par)

    fwd = jax.jit(image_wise_risk_forward)
    y = jax.block_until_ready(fwd(feat_maps, params))
    y_ref = reference_forward(feat_maps, params)

    assert y.shape == (B,), y.shape
    assert bool(jnp.allclose(y, y_ref, atol=1e-3, rtol=1e-3)), (y, y_ref)
    print("KERNEL_OK")
</pallas_src>

<mosaic_0001>
module attributes {stable_mosaic.version = 11 : i64} {
  func.func @_risk_head_kernel(%arg0: i32, %arg1: i32, %arg2: i32, %arg3: memref<1x2x256x128xbf16, #tpu.memory_space<vmem>>, %arg4: memref<1x256x256xf32, #tpu.memory_space<vmem>>, %arg5: memref<1x1x256xf32, #tpu.memory_space<vmem>>, %arg6: memref<1x1x256xf32, #tpu.memory_space<vmem>>, %arg7: memref<1x1x1xf32, #tpu.memory_space<vmem>>, %arg8: memref<1x2x1xf32, #tpu.memory_space<vmem>>, %arg9: memref<2x256x128xf32, #tpu.memory_space<vmem>>) attributes {dimension_semantics = [#tpu.dimension_semantics<parallel>, #tpu.dimension_semantics<parallel>, #tpu.dimension_semantics<arbitrary>], iteration_bounds = array<i64: 4, 1, 1>, scalar_prefetch = 0 : i64, scratch_operands = 1 : i64, tpu.core_type = #tpu.core_type<tc>, window_params = [{transform_indices = @transform_0, window_bounds = array<i64: 1, 2, 256, 128>}, {transform_indices = @transform_1, window_bounds = array<i64: 1, 256, 256>}, {transform_indices = @transform_2, window_bounds = array<i64: 1, 1, 256>}, {transform_indices = @transform_3, window_bounds = array<i64: 1, 1, 256>}, {transform_indices = @transform_4, window_bounds = array<i64: 1, 1, 1>}, {transform_indices = @transform_5, window_bounds = array<i64: 1, 2, 1>}]} {
    %c0 = arith.constant 0 : index
    %c0_0 = arith.constant 0 : index
    %c0_1 = arith.constant 0 : index
    %c0_2 = arith.constant 0 : index
    %0 = vector.load %arg3[%c0, %c0_0, %c0_1, %c0_2] : memref<1x2x256x128xbf16, #tpu.memory_space<vmem>>, vector<1x2x256x128xbf16>
    %1 = vector.shape_cast %0 : vector<1x2x256x128xbf16> to vector<2x256x128xbf16>
    %2 = arith.extf %1 : vector<2x256x128xbf16> to vector<2x256x128xf32>
    %c0_i32 = arith.constant 0 : i32
    %3 = arith.cmpi eq, %arg2, %c0_i32 : i32
    %4 = arith.extui %3 : i1 to i32
    %c0_i32_3 = arith.constant 0 : i32
    %5 = arith.cmpi ne, %4, %c0_i32_3 : i32
    scf.if %5 {
      %c0_8 = arith.constant 0 : index
      %c0_9 = arith.constant 0 : index
      %c0_10 = arith.constant 0 : index
      %12 = vector.load %arg9[%c0_8, %c0_9, %c0_10] : memref<2x256x128xf32, #tpu.memory_space<vmem>>, vector<2x256x128xf32>
      tpu.vector_store %arg9[%c0_8, %c0_9, %c0_10], %2 {strides = array<i32>} : memref<2x256x128xf32, #tpu.memory_space<vmem>>, vector<2x256x128xf32>,
    } else {
    }
    %c0_i32_4 = arith.constant 0 : i32
    %6 = arith.cmpi sgt, %arg2, %c0_i32_4 : i32
    %7 = arith.extui %6 : i1 to i32
    %c0_i32_5 = arith.constant 0 : i32
    %8 = arith.cmpi ne, %7, %c0_i32_5 : i32
    scf.if %8 {
      %c0_8 = arith.constant 0 : index
      %c0_9 = arith.constant 0 : index
      %c0_10 = arith.constant 0 : index
      %12 = vector.load %arg9[%c0_8, %c0_9, %c0_10] : memref<2x256x128xf32, #tpu.memory_space<vmem>>, vector<2x256x128xf32>
      %13 = arith.addf %12, %2 : vector<2x256x128xf32>
      %c0_11 = arith.constant 0 : index
      %c0_12 = arith.constant 0 : index
      %c0_13 = arith.constant 0 : index
      %14 = vector.load %arg9[%c0_11, %c0_12, %c0_13] : memref<2x256x128xf32, #tpu.memory_space<vmem>>, vector<2x256x128xf32>
      tpu.vector_store %arg9[%c0_11, %c0_12, %c0_13], %13 {strides = array<i32>} : memref<2x256x128xf32, #tpu.memory_space<vmem>>, vector<2x256x128xf32>,
    } else {
    }
    %c0_i32_6 = arith.constant 0 : i32
    %9 = arith.cmpi eq, %arg2, %c0_i32_6 : i32
    %10 = arith.extui %9 : i1 to i32
    %c0_i32_7 = arith.constant 0 : i32
    %11 = arith.cmpi ne, %10, %c0_i32_7 : i32
    scf.if %11 {
      %c0_8 = arith.constant 0 : index
      %c0_9 = arith.constant 0 : index
      %c0_10 = arith.constant 0 : index
      %12 = vector.load %arg9[%c0_8, %c0_9, %c0_10] : memref<2x256x128xf32, #tpu.memory_space<vmem>>, vector<2x256x128xf32>
      %cst = arith.constant dense<0.000000e+00> : vector<2x256xf32>
      %13 = vector.multi_reduction <add>, %12, %cst [2] : vector<2x256x128xf32> to vector<2x256xf32>
      %cst_11 = arith.constant 1.562500e-02 : f32
      %14 = vector.broadcast %cst_11 : f32 to vector<2x256xf32>
      %15 = arith.mulf %13, %14 : vector<2x256xf32>
      %c0_12 = arith.constant 0 : index
      %c0_13 = arith.constant 0 : index
      %c0_14 = arith.constant 0 : index
      %16 = vector.load %arg4[%c0_12, %c0_13, %c0_14] : memref<1x256x256xf32, #tpu.memory_space<vmem>>, vector<1x256x256xf32>
      %17 = vector.shape_cast %16 : vector<1x256x256xf32> to vector<256x256xf32>
      %cst_15 = arith.constant dense<0.000000e+00> : vector<2x256xf32>
      %18 = tpu.matmul %15, %17, %cst_15 {dimension_numbers = #tpu.dot_dimension_numbers<[1], [0], [0], [1], [0, 0, 1, 1], [], []>} : vector<2x256xf32>, vector<256x256xf32>, vector<2x256xf32> -> vector<2x256xf32>
      %c0_16 = arith.constant 0 : index
      %c0_17 = arith.constant 0 : index
      %c0_18 = arith.constant 0 : index
      %19 = vector.load %arg5[%c0_16, %c0_17, %c0_18] : memref<1x1x256xf32, #tpu.memory_space<vmem>>, vector<1x1x256xf32>
      %20 = vector.shape_cast %19 : vector<1x1x256xf32> to vector<1x256xf32>
      %21 = vector.broadcast %20 : vector<1x256xf32> to vector<2x256xf32>
      %22 = arith.addf %18, %21 : vector<2x256xf32>
      %cst_19 = arith.constant 0.000000e+00 : f32
      %23 = vector.broadcast %cst_19 : f32 to vector<2x256xf32>
      %24 = arith.maximumf %22, %23 : vector<2x256xf32>
      %c0_20 = arith.constant 0 : index
      %c0_21 = arith.constant 0 : index
      %c0_22 = arith.constant 0 : index
      %25 = vector.load %arg6[%c0_20, %c0_21, %c0_22] : memref<1x1x256xf32, #tpu.memory_space<vmem>>, vector<1x1x256xf32>
      %26 = vector.shape_cast %25 : vector<1x1x256xf32> to vector<1x256xf32>
      %27 = vector.broadcast %26 : vector<1x256xf32> to vector<2x256xf32>
      %28 = arith.mulf %24, %27 : vector<2x256xf32>
      %cst_23 = arith.constant dense<0.000000e+00> : vector<2xf32>
      %29 = vector.multi_reduction <add>, %28, %cst_23 [1] : vector<2x256xf32> to vector<2xf32>
      %30 = vector.shape_cast %29 : vector<2xf32> to vector<2x1xf32>
      %c0_24 = arith.constant 0 : index
      %c0_25 = arith.constant 0 : index
      %c0_26 = arith.constant 0 : index
      %31 = vector.load %arg7[%c0_24, %c0_25, %c0_26] : memref<1x1x1xf32, #tpu.memory_space<vmem>>, vector<1x1x1xf32>
      %32 = vector.shape_cast %31 : vector<1x1x1xf32> to vector<1x1xf32>
      %33 = vector.broadcast %32 : vector<1x1xf32> to vector<2x1xf32>
      %34 = arith.addf %30, %33 : vector<2x1xf32>
      %35 = arith.negf %34 : vector<2x1xf32>
      %36 = math.exp %35 : vector<2x1xf32>
      %cst_27 = arith.constant 1.000000e+00 : f32
      %37 = vector.broadcast %cst_27 : f32 to vector<2x1xf32>
      %38 = arith.addf %37, %36 : vector<2x1xf32>
      %39 = arith.divf %37, %38 : vector<2x1xf32>
      %c0_28 = arith.constant 0 : index
      %c0_29 = arith.constant 0 : index
      %c0_30 = arith.constant 0 : index
      %40 = vector.load %arg8[%c0_28, %c0_29, %c0_30] : memref<1x2x1xf32, #tpu.memory_space<vmem>>, vector<1x2x1xf32>
      %41 = vector.shape_cast %40 : vector<1x2x1xf32> to vector<2x1xf32>
      %42 = vector.shape_cast %39 : vector<2x1xf32> to vector<1x2x1xf32>
      tpu.vector_store %arg8[%c0_28, %c0_29, %c0_30], %42 {strides = array<i32>} : memref<1x2x1xf32, #tpu.memory_space<vmem>>, vector<1x2x1xf32>,
    } else {
    }
    return
  }
  func.func @transform_0(%arg0: i32, %arg1: i32, %arg2: i32) -> (i32, i32, i32, i32) {
    %c0_i32 = arith.constant 0 : i32
    %c0_i32_0 = arith.constant 0 : i32
    return %arg0, %arg1, %c0_i32, %arg2 : i32, i32, i32, i32
  }
  func.func @transform_1(%arg0: i32, %arg1: i32, %arg2: i32) -> (i32, i32, i32) {
    %c0_i32 = arith.constant 0 : i32
    %c0_i32_0 = arith.constant 0 : i32
    %c0_i32_1 = arith.constant 0 : i32
    return %arg0, %c0_i32, %c0_i32_0 : i32, i32, i32
  }
  func.func @transform_2(%arg0: i32, %arg1: i32, %arg2: i32) -> (i32, i32, i32) {
    %c0_i32 = arith.constant 0 : i32
    %c0_i32_0 = arith.constant 0 : i32
    %c0_i32_1 = arith.constant 0 : i32
    return %arg0, %c0_i32, %c0_i32_0 : i32, i32, i32
  }
  func.func @transform_3(%arg0: i32, %arg1: i32, %arg2: i32) -> (i32, i32, i32) {
    %c0_i32 = arith.constant 0 : i32
    %c0_i32_0 = arith.constant 0 : i32
    %c0_i32_1 = arith.constant 0 : i32
    return %arg0, %c0_i32, %c0_i32_0 : i32, i32, i32
  }
  func.func @transform_4(%arg0: i32, %arg1: i32, %arg2: i32) -> (i32, i32, i32) {
    %c0_i32 = arith.constant 0 : i32
    %c0_i32_0 = arith.constant 0 : i32
    %c0_i32_1 = arith.constant 0 : i32
    return %arg0, %c0_i32, %c0_i32_0 : i32, i32, i32
  }
  func.func @transform_5(%arg0: i32, %arg1: i32, %arg2: i32) -> (i32, i32, i32) {
    %c0_i32 = arith.constant 0 : i32
    %c0_i32_0 = arith.constant 0 : i32
    return %arg0, %arg1, %c0_i32 : i32, i32, i32
  }
}

</mosaic_0001>

<bundles_post_ra>
// kernel: image_wise_risk_forward.1
= control target key start
LH: loop header
LB: loop body
LE: loop exit
PB: predicated region body
PF: predicated region fallthrough
CT: control target
= control target key end

     0   :  { %s1991_s18 = smov 0   ;;  %s1993_s19 = smov 0   ;;  %s2376_s0 = inlined_call_operand.vmem [shape: bf16[4,2,256,128], index: 0, kind: input, shape index: {}]   ;;  %s2377_s1 = inlined_call_operand.vmem [shape: f32[4,256,256], index: 1, kind: input, shape index: {}]   ;;  %s2378_s2 = inlined_call_operand.vmem [shape: f32[4,1,256], index: 2, kind: input, shape index: {}]   ;;  %s2379_s3 = inlined_call_operand.vmem [shape: f32[4,1,256], index: 3, kind: input, shape index: {}]   ;;  %s2380_s4 = inlined_call_operand.vmem [shape: f32[4,1,1], index: 4, kind: input, shape index: {}]   ;;  %s2381_s5 = inlined_call_operand.vmem [shape: f32[4,2,1], index: 5, kind: output, shape index: {}]  }
   0x1   :  { %s1995_s20 = smov 0  }
   0x2 LB: > { %s34_s21 = sadd.s32 1, %s1955_s19  ;;  %p1736_p0 = scmp.ge.s32.totalorder %s1959_s20, 1  ;;  %s1959_s20 = sphi %s1995_s20, %s15_s20   ;;  %s1955_s19 = sphi %s1993_s19, %s2383_s19   ;;  %s1951_s18 = sphi %s1991_s18, %s2382_s18  }
   0x3   : > { %p36_p1 = scmp.ge.s32.totalorder %s34_s21, 4  ;;  %p257_p2 = scmp.lt.s32.totalorder %s1959_s20, 5 }
   0x5   : > { %s2385_s21 = smov (%p36_p1, %s34_s21), 0  ;;  %p258_p3 = pnand %p1736_p0, %p257_p2 }
   0x6   : > { %p312_p4 = scmp.lt.s32.totalorder (!%p258_p3), %s1951_s18, 3 }
   0x7   : > { %261 = sbr.rel (%p258_p3) target bundleno = 664 (0x298), region = 40 }
   0xc   : > { %s2387_s18 = smov (!%p312_p4, %s1951_s18), 3  ;;  %vm1150_vm0 = vcmask 130112   ;;  %vm1157_vm1 = vcmask 195712   ;;  %vm1164_vm2 = vcmask 261312   ;;  %vm1171_vm3 = vcmask 326912  }
   0xd   : > { %s1748_s22 = sshll.u32 %s2387_s18, 8  ;;  %s1749_s26 = sshll.u32 %s2387_s18, 9  ;;  %vm1178_vm4 = vcmask 392512   ;;  %vm1185_vm5 = vcmask 458112   ;;  %vm1192_vm6 = vcmask 523712   ;;  %vm1199_vm7 = vcmask 589312  }
   0xe   : > { %s2015_s25 = scalar_lea.vmem %s2376_s0, %s1748_s22  ;;  %s2042_s29 = scalar_lea.vmem %s2377_s1, %s1749_s26  ;;  %vm1206_vm8 = vcmask 654912   ;;  %vm1213_vm9 = vcmask 720512   ;;  %vm1220_vm10 = vcmask 786112   ;;  %vm1227_vm11 = vcmask 851712  }
   0xf   : > { %v1901_v0 = vld [vmem:[%s2015_s25 + $0xc0] sm:$0xff]   ;;  %v1886_v10 = vld [vmem:[%s2015_s25 + $0x48] sm:$0xff]   ;;  %v1887_v22 = vld [vmem:[%s2015_s25 + $0x50] sm:$0xff]   ;;  %vm1234_vm12 = vcmask 917312   ;;  %vm1241_vm13 = vcmask 982912   ;;  %vm1248_vm14 = vcmask 1048512   ;;  %s340_s14 = scalar_lea.vmem %s2380_s4, %s2387_s18 }
  0x10   : > { %v1885_v1 = vld [vmem:[%s2015_s25 + $0x40] sm:$0xff]   ;;  %v1848_v2 = vunpack.c.l.bf16 %v1901_v0  ;;  %v1849_v4 = vunpack.c.h.bf16 %v1901_v0  ;;  %v1788_v12 = vunpack.c.l.bf16 %v1886_v10  ;;  %v1902_v13 = vld [vmem:[%s2015_s25 + $0xc8] sm:$0xff]   ;;  %v1789_v17 = vunpack.c.h.bf16 %v1886_v10  ;;  %v1903_v25 = vld [vmem:[%s2015_s25 + $0xd0] sm:$0xff]   ;;  %s2347_s30 = sshll.u32 %s2387_s18, 1 }
  0x11   : > { %v1784_v3 = vunpack.c.l.bf16 %v1885_v1  ;;  %v1785_v5 = vunpack.c.h.bf16 %v1885_v1  ;;  %v1751_v6 = vld [vmem:[%s2015_s25] sm:$0xff]   ;;  %v1852_v14 = vunpack.c.l.bf16 %v1902_v13  ;;  %v1878_v16 = vld [vmem:[%s2015_s25 + $0x8] sm:$0xff]   ;;  %v1853_v20 = vunpack.c.h.bf16 %v1902_v13  ;;  %v1879_v28 = vld [vmem:[%s2015_s25 + $0x10] sm:$0xff]   ;;  %s333_s8 = scalar_lea.vmem %s2378_s2, %s2347_s30  ;;  %s337_s11 = scalar_lea.vmem %s2379_s3, %s2347_s30 }
  0x12   : > { %903 = vadd.xlane.f32.xlu1 %v1848_v2  ;;  %v1753_v7 = vunpack.c.h.bf16 %v1751_v6  ;;  %v1752_v8 = vunpack.c.l.bf16 %v1751_v6  ;;  %v1893_v9 = vld [vmem:[%s2015_s25 + $0x80] sm:$0xff]   ;;  %v1756_v18 = vunpack.c.l.bf16 %v1878_v16  ;;  %v1894_v19 = vld [vmem:[%s2015_s25 + $0x88] sm:$0xff]   ;;  %v1792_v23 = vunpack.c.l.bf16 %v1887_v22  ;;  %v1895_v31 = vld [vmem:[%s2015_s25 + $0x90] sm:$0xff]   ;;  %s347_s17 = scalar_lea.vmem %s2381_s5, %s2347_s30 }
  0x13   : > { %839 = vadd.xlane.f32.xlu0 %v1784_v3  ;;  %v1816_v11 = vunpack.c.l.bf16 %v1893_v9  ;;  %v1817_v15 = vunpack.c.h.bf16 %v1893_v9  ;;  %v1820_v21 = vunpack.c.l.bf16 %v1894_v19  ;;  %v1757_v24 = vunpack.c.h.bf16 %v1878_v16  ;;  %v1888_v34 = vld [vmem:[%s2015_s25 + $0x58] sm:$0xff]   ;;  %v1889_v46 = vld [vmem:[%s2015_s25 + $0x60] sm:$0xff]   ;;  %v1890_v58 = vld [vmem:[%s2015_s25 + $0x68] sm:$0xff]  }
  0x14   : > { %v1856_v26 = vunpack.c.l.bf16 %v1903_v25  ;;  %v1821_v27 = vunpack.c.h.bf16 %v1894_v19  ;;  %v1793_v29 = vunpack.c.h.bf16 %v1887_v22  ;;  %v1760_v30 = vunpack.c.l.bf16 %v1879_v28  ;;  %v1904_v37 = vld [vmem:[%s2015_s25 + $0xd8] sm:$0xff]   ;;  %v1905_v49 = vld [vmem:[%s2015_s25 + $0xe0] sm:$0xff]   ;;  %v1906_v61 = vld [vmem:[%s2015_s25 + $0xe8] sm:$0xff]  }
  0x15   : > { %v1857_v32 = vunpack.c.h.bf16 %v1903_v25  ;;  %v1824_v33 = vunpack.c.l.bf16 %v1895_v31  ;;  %v1796_v35 = vunpack.c.l.bf16 %v1888_v34  ;;  %v1761_v36 = vunpack.c.h.bf16 %v1879_v28  ;;  %v1880_v40 = vld [vmem:[%s2015_s25 + $0x18] sm:$0xff]   ;;  %v1881_v52 = vld [vmem:[%s2015_s25 + $0x20] sm:$0xff]   ;;  %v1029_v1 = vld [vmem:[%s2042_s29 + $0xf0] sm:$0xff] }
  0x16   : > { %905 = vadd.xlane.f32.xlu1 %v1849_v4  ;;  %v1860_v38 = vunpack.c.l.bf16 %v1904_v37  ;;  %v1825_v39 = vunpack.c.h.bf16 %v1895_v31  ;;  %v1797_v41 = vunpack.c.h.bf16 %v1888_v34  ;;  %v1764_v42 = vunpack.c.l.bf16 %v1880_v40  ;;  %v1896_v43 = vld [vmem:[%s2015_s25 + $0x98] sm:$0xff]   ;;  %v1897_v55 = vld [vmem:[%s2015_s25 + $0xa0] sm:$0xff]   ;;  %v1882_v2 = vld [vmem:[%s2015_s25 + $0x28] sm:$0xff]  }
  0x17   : > { %841 = vadd.xlane.f32.xlu0 %v1785_v5  ;;  %v1861_v44 = vunpack.c.h.bf16 %v1904_v37  ;;  %v1828_v45 = vunpack.c.l.bf16 %v1896_v43  ;;  %v1800_v47 = vunpack.c.l.bf16 %v1889_v46  ;;  %v1765_v48 = vunpack.c.h.bf16 %v1880_v40  ;;  %v1030_v62 = vld [vmem:[%s2042_s29 + $0xf8] sm:$0xff]  ;;  %v1028_v3 = vld [vmem:[%s2042_s29 + $0xe8] sm:$0xff]  ;;  %v1027_v4 = vld [vmem:[%s2042_s29 + $0xe0] sm:$0xff] }
  0x18   : > { %v1864_v50 = vunpack.c.l.bf16 %v1905_v49  ;;  %v1829_v51 = vunpack.c.h.bf16 %v1896_v43  ;;  %v1801_v53 = vunpack.c.h.bf16 %v1889_v46  ;;  %v1768_v54 = vunpack.c.l.bf16 %v1881_v52  ;;  %1492 = vmatprep.subr.mxu0 %v1030_v62  ;;  %v1026_v5 = vld [vmem:[%s2042_s29 + $0xd8] sm:$0xff]  ;;  %v1898_v9 = vld [vmem:[%s2015_s25 + $0xa8] sm:$0xff]   ;;  %v1021_v16 = vld [vmem:[%s2042_s29 + $0xb0] sm:$0xff] }
  0x19   : > { %v1865_v56 = vunpack.c.h.bf16 %v1905_v49  ;;  %v1832_v57 = vunpack.c.l.bf16 %v1897_v55  ;;  %v1804_v59 = vunpack.c.l.bf16 %v1890_v58  ;;  %v1769_v60 = vunpack.c.h.bf16 %v1881_v52  ;;  %1493 = vmatpush1.msra.mxu0 %v1029_v1  ;;  %v1024_v10 = vld [vmem:[%s2042_s29 + $0xc8] sm:$0xff]  ;;  %v1018_v22 = vld [vmem:[%s2042_s29 + $0x98] sm:$0xff]  ;;  %v1015_v28 = vld [vmem:[%s2042_s29 + $0x80] sm:$0xff] }
  0x1a   : > { %809 = vadd.xlane.f32.xlu1 %v1753_v7  ;;  %v1868_v63 = vunpack.c.l.bf16 %v1906_v61  ;;  %v1833_v0 = vunpack.c.h.bf16 %v1897_v55  ;;  %1494 = vmatprep.subr.mxu0 %v1028_v3  ;;  %v1805_v6 = vunpack.c.h.bf16 %v1890_v58  ;;  %v1772_v7 = vunpack.c.l.bf16 %v1882_v2  ;;  %v1012_v34 = vld [vmem:[%s2042_s29 + $0x68] sm:$0xff]  ;;  %v1009_v40 = vld [vmem:[%s2042_s29 + $0x50] sm:$0xff]  ;;  %v1006_v46 = vld [vmem:[%s2042_s29 + $0x38] sm:$0xff] }
  0x1b   : > { %807 = vadd.xlane.f32.xlu0 %v1752_v8  ;;  %v1025_v8 = vld [vmem:[%s2042_s29 + $0xd0] sm:$0xff]  ;;  %1495 = vmatpush1.msra.mxu0 %v1027_v4  ;;  %v1836_v13 = vunpack.c.l.bf16 %v1898_v9  ;;  %v1773_v19 = vunpack.c.h.bf16 %v1882_v2  ;;  %v1837_v25 = vunpack.c.h.bf16 %v1898_v9  ;;  %v1003_v52 = vld [vmem:[%s2042_s29 + $0x20] sm:$0xff]  ;;  %v1000_v58 = vld [vmem:[%s2042_s29 + $0x8] sm:$0xff]  ;;  %vm1487_vm15 = vcmask 1041409  }
  0x1c   : > { %1496 = vmatprep.subr.mxu0 %v1026_v5  ;;  %v1062_v62 = vld [vmem:[%s2042_s29 + $0x1f8] sm:$0xff]  ;;  %v1059_v3 = vld [vmem:[%s2042_s29 + $0x1e0] sm:$0xff]  ;;  %v1057_v5 = vld [vmem:[%s2042_s29 + $0x1d0] sm:$0xff] }
  0x1d   : > { %1497 = vmatpush1.msra.mxu0 %v1025_v8  ;;  %v1058_v4 = vld [vmem:[%s2042_s29 + $0x1d8] sm:$0xff]  ;;  %v1053_v9 = vld [vmem:[%s2042_s29 + $0x1b0] sm:$0xff] }
  0x1e   : > { %871 = vadd.xlane.f32.xlu1 %v1816_v11  ;;  %v1023_v11 = vld [vmem:[%s2042_s29 + $0xc0] sm:$0xff]  ;;  %1498 = vmatprep.subr.mxu0 %v1024_v10  ;;  %v1054_v8 = vld [vmem:[%s2042_s29 + $0x1b8] sm:$0xff]  ;;  %v1052_v10 = vld [vmem:[%s2042_s29 + $0x1a8] sm:$0xff] }
  0x1f   : > { %843 = vadd.xlane.f32.xlu0 %v1788_v12  ;;  %v1869_v12 = vunpack.c.h.bf16 %v1906_v61  ;;  %1499 = vmatpush1.msra.mxu0 %v1023_v11  ;;  %v1051_v11 = vld [vmem:[%s2042_s29 + $0x1a0] sm:$0xff] }
  0x22   : > { %907 = vadd.xlane.f32.xlu1 %v1852_v14  ;;  %v1022_v14 = vld [vmem:[%s2042_s29 + $0xb8] sm:$0xff] }
  0x23   : > { %873 = vadd.xlane.f32.xlu0 %v1817_v15  ;;  %v1891_v15 = vld [vmem:[%s2015_s25 + $0x70] sm:$0xff]   ;;  %1500 = vmatprep.subr.mxu0 %v1022_v14 }
  0x24   : > { %1501 = vmatpush1.msra.mxu0 %v1021_v16  ;;  %v1049_v14 = vld [vmem:[%s2042_s29 + $0x190] sm:$0xff]  ;;  %v1047_v16 = vld [vmem:[%s2042_s29 + $0x180] sm:$0xff] }
  0x26   : > { %845 = vadd.xlane.f32.xlu1 %v1789_v17  ;;  %v1020_v17 = vld [vmem:[%s2042_s29 + $0xa8] sm:$0xff] }
  0x27   : > { %811 = vadd.xlane.f32.xlu0 %v1756_v18  ;;  %v1808_v18 = vunpack.c.l.bf16 %v1891_v15  ;;  %1502 = vmatprep.subr.mxu0 %v1020_v17 }
  0x2a   : > { %909 = vadd.xlane.f32.xlu1 %v1853_v20  ;;  %v1019_v20 = vld [vmem:[%s2042_s29 + $0xa0] sm:$0xff] }
  0x2b   : > { %875 = vadd.xlane.f32.xlu0 %v1820_v21  ;;  %v1907_v21 = vld [vmem:[%s2015_s25 + $0xf0] sm:$0xff]   ;;  %1503 = vmatpush1.msra.mxu0 %v1019_v20 }
  0x2c   : > { %1504 = vmatprep.subr.mxu0 %v1018_v22  ;;  %v1044_v22 = vld [vmem:[%s2042_s29 + $0x168] sm:$0xff] }
  0x2e   : > { %847 = vadd.xlane.f32.xlu1 %v1792_v23  ;;  %v1017_v23 = vld [vmem:[%s2042_s29 + $0x90] sm:$0xff] }
  0x2f   : > { %813 = vadd.xlane.f32.xlu0 %v1757_v24  ;;  %v1872_v24 = vunpack.c.l.bf16 %v1907_v21  ;;  %1505 = vmatpush1.msra.mxu0 %v1017_v23 }
  0x32   : > { %911 = vadd.xlane.f32.xlu1 %v1856_v26  ;;  %v1016_v26 = vld [vmem:[%s2042_s29 + $0x88] sm:$0xff] }
  0x33   : > { %877 = vadd.xlane.f32.xlu0 %v1821_v27  ;;  %v1883_v27 = vld [vmem:[%s2015_s25 + $0x30] sm:$0xff]   ;;  %1506 = vmatprep.subr.mxu0 %v1016_v26  ;;  %v1042_v26 = vld [vmem:[%s2042_s29 + $0x158] sm:$0xff] }
  0x34   : > { %v1776_v31 = vunpack.c.l.bf16 %v1883_v27  ;;  %1507 = vmatpush1.msra.mxu0 %v1015_v28  ;;  %v1777_v43 = vunpack.c.h.bf16 %v1883_v27  ;;  %v1041_v27 = vld [vmem:[%s2042_s29 + $0x150] sm:$0xff] }
  0x36   : > { %849 = vadd.xlane.f32.xlu1 %v1793_v29  ;;  %v1014_v29 = vld [vmem:[%s2042_s29 + $0x78] sm:$0xff] }
  0x37   : > { %815 = vadd.xlane.f32.xlu0 %v1760_v30  ;;  %v1809_v30 = vunpack.c.h.bf16 %v1891_v15  ;;  %1508 = vmatprep.subr.mxu0 %v1014_v29  ;;  %v1048_v15 = vld [vmem:[%s2042_s29 + $0x188] sm:$0xff] }
  0x3a   : > { %913 = vadd.xlane.f32.xlu1 %v1857_v32  ;;  %v1013_v32 = vld [vmem:[%s2042_s29 + $0x70] sm:$0xff] }
  0x3b   : > { %879 = vadd.xlane.f32.xlu0 %v1824_v33  ;;  %v1899_v33 = vld [vmem:[%s2015_s25 + $0xb0] sm:$0xff]   ;;  %1509 = vmatpush1.msra.mxu0 %v1013_v32  ;;  %v1040_v32 = vld [vmem:[%s2042_s29 + $0x148] sm:$0xff] }
  0x3c   : > { %v1840_v37 = vunpack.c.l.bf16 %v1899_v33  ;;  %1510 = vmatprep.subr.mxu0 %v1012_v34  ;;  %v1841_v49 = vunpack.c.h.bf16 %v1899_v33 }
  0x3e   : > { %851 = vadd.xlane.f32.xlu1 %v1796_v35  ;;  %v1011_v35 = vld [vmem:[%s2042_s29 + $0x60] sm:$0xff] }
  0x3f   : > { %817 = vadd.xlane.f32.xlu0 %v1761_v36  ;;  %v1873_v36 = vunpack.c.h.bf16 %v1907_v21  ;;  %1511 = vmatpush1.msra.mxu0 %v1011_v35  ;;  %v1039_v35 = vld [vmem:[%s2042_s29 + $0x140] sm:$0xff] }
  0x42   : > { %915 = vadd.xlane.f32.xlu1 %v1860_v38  ;;  %v1010_v38 = vld [vmem:[%s2042_s29 + $0x58] sm:$0xff] }
  0x43   : > { %881 = vadd.xlane.f32.xlu0 %v1825_v39  ;;  %v1892_v39 = vld [vmem:[%s2015_s25 + $0x78] sm:$0xff]   ;;  %1512 = vmatprep.subr.mxu0 %v1010_v38 }
  0x44   : > { %1513 = vmatpush1.msra.mxu0 %v1009_v40  ;;  %v1038_v38 = vld [vmem:[%s2042_s29 + $0x138] sm:$0xff]  ;;  %v1037_v40 = vld [vmem:[%s2042_s29 + $0x130] sm:$0xff] }
  0x46   : > { %853 = vadd.xlane.f32.xlu1 %v1797_v41  ;;  %v1008_v41 = vld [vmem:[%s2042_s29 + $0x48] sm:$0xff] }
  0x47   : > { %819 = vadd.xlane.f32.xlu0 %v1764_v42  ;;  %v1812_v42 = vunpack.c.l.bf16 %v1892_v39  ;;  %1514 = vmatprep.subr.mxu0 %v1008_v41 }
  0x4a   : > { %917 = vadd.xlane.f32.xlu1 %v1861_v44  ;;  %v1007_v44 = vld [vmem:[%s2042_s29 + $0x40] sm:$0xff] }
  0x4b   : > { %883 = vadd.xlane.f32.xlu0 %v1828_v45  ;;  %v1908_v45 = vld [vmem:[%s2015_s25 + $0xf8] sm:$0xff]   ;;  %1515 = vmatpush1.msra.mxu0 %v1007_v44 }
  0x4c   : > { %1516 = vmatprep.subr.mxu0 %v1006_v46 }
  0x4e   : > { %855 = vadd.xlane.f32.xlu1 %v1800_v47  ;;  %v1005_v47 = vld [vmem:[%s2042_s29 + $0x30] sm:$0xff] }
  0x4f   : > { %821 = vadd.xlane.f32.xlu0 %v1765_v48  ;;  %v1876_v48 = vunpack.c.l.bf16 %v1908_v45  ;;  %1517 = vmatpush1.msra.mxu0 %v1005_v47 }
  0x52   : > { %919 = vadd.xlane.f32.xlu1 %v1864_v50  ;;  %v1004_v50 = vld [vmem:[%s2042_s29 + $0x28] sm:$0xff] }
  0x53   : > { %885 = vadd.xlane.f32.xlu0 %v1829_v51  ;;  %v1884_v51 = vld [vmem:[%s2015_s25 + $0x38] sm:$0xff]   ;;  %1518 = vmatprep.subr.mxu0 %v1004_v50 }
  0x54   : > { %v1780_v55 = vunpack.c.l.bf16 %v1884_v51  ;;  %1519 = vmatpush1.msra.mxu0 %v1003_v52  ;;  %v1781_v2 = vunpack.c.h.bf16 %v1884_v51 }
  0x56   : > { %857 = vadd.xlane.f32.xlu1 %v1801_v53  ;;  %v1002_v53 = vld [vmem:[%s2042_s29 + $0x18] sm:$0xff] }
  0x57   : > { %823 = vadd.xlane.f32.xlu0 %v1768_v54  ;;  %v1813_v54 = vunpack.c.h.bf16 %v1892_v39  ;;  %1520 = vmatprep.subr.mxu0 %v1002_v53  ;;  %v1034_v53 = vld [vmem:[%s2042_s29 + $0x118] sm:$0xff] }
  0x5a   : > { %921 = vadd.xlane.f32.xlu1 %v1865_v56  ;;  %v1001_v56 = vld [vmem:[%s2042_s29 + $0x10] sm:$0xff] }
  0x5b   : > { %887 = vadd.xlane.f32.xlu0 %v1832_v57  ;;  %v1900_v57 = vld [vmem:[%s2015_s25 + $0xb8] sm:$0xff]   ;;  %1521 = vmatpush1.msra.mxu0 %v1001_v56 }
  0x5c   : > { %v1844_v61 = vunpack.c.l.bf16 %v1900_v57  ;;  %1522 = vmatprep.subr.mxu0 %v1000_v58  ;;  %v1845_v1 = vunpack.c.h.bf16 %v1900_v57  ;;  %v1032_v58 = vld [vmem:[%s2042_s29 + $0x108] sm:$0xff] }
  0x5e   : > { %859 = vadd.xlane.f32.xlu1 %v1804_v59  ;;  %v999_v59 = vld [vmem:[%s2042_s29] sm:$0xff] }
  0x5f   : > { %825 = vadd.xlane.f32.xlu0 %v1769_v60  ;;  %v1877_v60 = vunpack.c.h.bf16 %v1908_v45  ;;  %1523 = vmatpush1.msra.mxu0 %v999_v59  ;;  %v1036_v45 = vld [vmem:[%s2042_s29 + $0x128] sm:$0xff] }
  0x60   : > { %1524 = vmatprep.subr.mxu0 %v1062_v62 }
  0x62   : > { %923 = vadd.xlane.f32.xlu1 %v1868_v63  ;;  %v1061_v63 = vld [vmem:[%s2042_s29 + $0x1f0] sm:$0xff] }
  0x63   : > { %889 = vadd.xlane.f32.xlu0 %v1833_v0  ;;  %v1060_v0 = vld [vmem:[%s2042_s29 + $0x1e8] sm:$0xff]  ;;  %1525 = vmatpush2.msra.mxu0 %v1061_v63 }
  0x64   : > { %1526 = vmatprep.subr.mxu0 %v1060_v0 }
  0x65   : > { %1527 = vmatpush2.msra.mxu0 %v1059_v3 }
  0x66   : > { %861 = vadd.xlane.f32.xlu1 %v1805_v6  ;;  %v1056_v6 = vld [vmem:[%s2042_s29 + $0x1c8] sm:$0xff]  ;;  %1528 = vmatprep.subr.mxu0 %v1058_v4 }
  0x67   : > { %827 = vadd.xlane.f32.xlu0 %v1772_v7  ;;  %v1055_v7 = vld [vmem:[%s2042_s29 + $0x1c0] sm:$0xff]  ;;  %1529 = vmatpush2.msra.mxu0 %v1057_v5 }
  0x68   : > { %1530 = vmatprep.subr.mxu0 %v1056_v6 }
  0x69   : > { %1531 = vmatpush2.msra.mxu0 %v1055_v7 }
  0x6a   : > { %925 = vadd.xlane.f32.xlu1 %v1869_v12  ;;  %1532 = vmatprep.subr.mxu0 %v1054_v8  ;;  %v1065_v12 = vlaneseq }
  0x6b   : > { %891 = vadd.xlane.f32.xlu0 %v1836_v13  ;;  %1533 = vmatpush2.msra.mxu0 %v1053_v9  ;;  %v1050_v13 = vld [vmem:[%s2042_s29 + $0x198] sm:$0xff] }
  0x6c   : > { %1534 = vmatprep.subr.mxu0 %v1052_v10  ;;  %v2103_v17 = vand.u32 127, %v1065_v12  ;;  %v2107_v20 = vshrl.u32 %v1065_v12, 7 }
  0x6d   : > { %1535 = vmatpush2.msra.mxu0 %v1051_v11 }
  0x6e   : > { %863 = vadd.xlane.f32.xlu1 %v1808_v18  ;;  %1536 = vmatprep.subr.mxu0 %v1050_v13  ;;  %v1046_v18 = vld [vmem:[%s2042_s29 + $0x178] sm:$0xff]  ;;  %v1145_v21 = vadd.s32 4294967288, %v2103_v17  ;;  %v2116_v28 = vsub.s32 %v2103_v17, %v2107_v20  ;;  %v1152_v39 = vadd.s32 4294967280, %v2103_v17 }
  0x6f   : > { %829 = vadd.xlane.f32.xlu0 %v1773_v19  ;;  %1537 = vmatpush2.msra.mxu0 %v1049_v14  ;;  %v1045_v19 = vld [vmem:[%s2042_s29 + $0x170] sm:$0xff] }
  0x70   : > { %1538 = vmatprep.subr.mxu0 %v1048_v15  ;;  %v1155_v57 = vsub.s32 %v1152_v39, %v2107_v20 }
  0x71   : > { %1539 = vmatpush2.msra.mxu0 %v1047_v16 }
  0x72   : > { %927 = vadd.xlane.f32.xlu1 %v1872_v24  ;;  %1540 = vmatprep.subr.mxu0 %v1046_v18 }
  0x73   : > { %893 = vadd.xlane.f32.xlu0 %v1837_v25  ;;  %v1043_v25 = vld [vmem:[%s2042_s29 + $0x160] sm:$0xff]  ;;  %1541 = vmatpush2.msra.mxu0 %v1045_v19 }
  0x74   : > { %1542 = vmatprep.subr.mxu0 %v1044_v22  ;;  %v1166_v22 = vadd.s32 4294967264, %v2103_v17 }
  0x75   : > { %1543 = vmatpush2.msra.mxu0 %v1043_v25 }
  0x76   : > { %865 = vadd.xlane.f32.xlu1 %v1809_v30  ;;  %1544 = vmatprep.subr.mxu0 %v1042_v26 }
  0x77   : > { %831 = vadd.xlane.f32.xlu0 %v1776_v31  ;;  %v2119_v31 = vsub.s32 %v1145_v21, %v2107_v20  ;;  %1545 = vmatpush2.msra.mxu0 %v1041_v27 }
  0x78   : > { %1546 = vmatprep.subr.mxu0 %v1040_v32 }
  0x79   : > { %1547 = vmatpush2.msra.mxu0 %v1039_v35 }
  0x7a   : > { %929 = vadd.xlane.f32.xlu1 %v1873_v36  ;;  %1548 = vmatprep.subr.mxu0 %v1038_v38 }
  0x7b   : > { %895 = vadd.xlane.f32.xlu0 %v1840_v37  ;;  %1549 = vmatpush2.msra.mxu0 %v1037_v40  ;;  %v1173_v40 = vadd.s32 4294967256, %v2103_v17 }
  0x7c   : > { %1550 = vmatprep.subr.mxu0 %v1036_v45 }
  0x7e   : > { %867 = vadd.xlane.f32.xlu1 %v1812_v42 }
  0x7f   : > { %833 = vadd.xlane.f32.xlu0 %v1777_v43 }
  0x82   : > { %931 = vadd.xlane.f32.xlu1 %v1876_v48  ;;  %v1035_v48 = vld [vmem:[%s2042_s29 + $0x120] sm:$0xff] }
  0x83   : > { %897 = vadd.xlane.f32.xlu0 %v1841_v49  ;;  %1551 = vmatpush2.msra.mxu0 %v1035_v48 }
  0x84   : > { %1552 = vmatprep.subr.mxu0 %v1034_v53 }
  0x86   : > { %869 = vadd.xlane.f32.xlu1 %v1813_v54  ;;  %v1033_v54 = vld [vmem:[%s2042_s29 + $0x110] sm:$0xff] }
  0x87   : > { %835 = vadd.xlane.f32.xlu0 %v1780_v55  ;;  %1553 = vmatpush2.msra.mxu0 %v1033_v54 }
  0x88   : > { %1554 = vmatprep.subr.mxu0 %v1032_v58  ;;  %v1180_v58 = vadd.s32 4294967248, %v2103_v17 }
  0x8a   : > { %933 = vadd.xlane.f32.xlu1 %v1877_v60 }
  0x8b   : > { %899 = vadd.xlane.f32.xlu0 %v1844_v61  ;;  %v1031_v61 = vld [vmem:[%s2042_s29 + $0x100] sm:$0xff] }
  0x8c   : > { %1555 = vmatpush2.msra.mxu0 %v1031_v61 }
  0x8e   : > { %901 = vadd.xlane.f32.xlu1 %v1845_v1 }
  0x8f   : > { %837 = vadd.xlane.f32.xlu0 %v1781_v2  ;;  %v1159_v2 = vadd.s32 4294967272, %v2103_v17 }
  0x91   : > { %v1162_v11 = vsub.s32 %v1159_v2, %v2107_v20 }
  0x9b   : > { %v904_v23 = vpop.xlane.xlu1 %903 }
  0x9c   : > { %v840_v24 = vpop.xlane.xlu0 %839  ;;  %v983_v29 = vmul.f32 0.015625, %v904_v23 }
  0x9d   : > { %v951_v30 = vmul.f32 0.015625, %v840_v24 }
  0x9e   : > { %v1411_v41 = vrot.slane %v983_v29, %v2116_v28 }
  0x9f   : > { %v906_v33 = vpop.xlane.xlu1 %905  ;;  %v1253_v42 = vrot.slane %v951_v30, %v2116_v28 }
  0xa0   : > { %v842_v34 = vpop.xlane.xlu0 %841  ;;  %v984_v36 = vmul.f32 0.015625, %v906_v33 }
  0xa1   : > { %v952_v37 = vmul.f32 0.015625, %v842_v34 }
  0xa2   : > { %v1415_v43 = vrot.slane %v984_v36, %v2119_v31 }
  0xa3   : > { %v1257_v44 = vrot.slane %v952_v37, %v2119_v31  ;;  %v810_v46 = vpop.xlane.xlu1 %809 }
  0xa4   : > { %v808_v47 = vpop.xlane.xlu0 %807  ;;  %v1416_v49 = vsel %vm1150_vm0, %v1415_v43, %v1411_v41  ;;  %v936_v51 = vmul.f32 0.015625, %v810_v46 }
  0xa5   : > { %v1258_v50 = vsel %vm1150_vm0, %v1257_v44, %v1253_v42  ;;  %v935_v52 = vmul.f32 0.015625, %v808_v47 }
  0xa6   : > { %v1149_v55 = vrot.slane %v936_v51, %v2119_v31 }
  0xa7   : > { %v1144_v56 = vrot.slane %v935_v52, %v2116_v28  ;;  %v872_v59 = vpop.xlane.xlu1 %871 }
  0xa8   : > { %v844_v60 = vpop.xlane.xlu0 %843  ;;  %v967_v0 = vmul.f32 0.015625, %v872_v59 }
  0xa9   : > { %v1151_v62 = vsel %vm1150_vm0, %v1149_v55, %v1144_v56  ;;  %v953_v63 = vmul.f32 0.015625, %v844_v60 }
  0xaa   : > { %v1332_v8 = vrot.slane %v967_v0, %v2116_v28 }
  0xab   : > { %v1262_v1 = vrot.slane %v953_v63, %v1155_v57  ;;  %v908_v3 = vpop.xlane.xlu1 %907 }
  0xac   : > { %v874_v4 = vpop.xlane.xlu0 %873  ;;  %v985_v6 = vmul.f32 0.015625, %v908_v3  ;;  %v2165_v3 = vsub.s32 %v1180_v58, %v2107_v20  ;;  %v1229_v58 = vadd.s32 4294967192, %v2103_v17 }
  0xad   : > { %v1263_v5 = vsel %vm1157_vm1, %v1262_v1, %v1258_v50  ;;  %v968_v7 = vmul.f32 0.015625, %v874_v4 }
  0xae   : > { %v1420_v9 = vrot.slane %v985_v6, %v1155_v57 }
  0xaf   : > { %v1336_v10 = vrot.slane %v968_v7, %v2119_v31  ;;  %v846_v12 = vpop.xlane.xlu1 %845  ;;  %v1169_v31 = vsub.s32 %v1166_v22, %v2107_v20 }
  0xb0   : > { %v812_v13 = vpop.xlane.xlu0 %811  ;;  %v1421_v14 = vsel %vm1157_vm1, %v1420_v9, %v1416_v49  ;;  %v954_v16 = vmul.f32 0.015625, %v846_v12  ;;  %v1176_v49 = vsub.s32 %v1173_v40, %v2107_v20 }
  0xb1   : > { %v1337_v15 = vsel %vm1150_vm0, %v1336_v10, %v1332_v8  ;;  %v937_v18 = vmul.f32 0.015625, %v812_v13  ;;  %vm1579_vm0 = vcmask 1041408  }
  0xb2   : > { %v1267_v19 = vrot.slane %v954_v16, %v1162_v11 }
  0xb3   : > { %v1156_v21 = vrot.slane %v937_v18, %v1155_v57  ;;  %v910_v23 = vpop.xlane.xlu1 %909 }
  0xb4   : > { %v876_v24 = vpop.xlane.xlu0 %875  ;;  %v1268_v25 = vsel %vm1164_vm2, %v1267_v19, %v1263_v5  ;;  %v986_v27 = vmul.f32 0.015625, %v910_v23 }
  0xb5   : > { %v1158_v26 = vsel %vm1157_vm1, %v1156_v21, %v1151_v62  ;;  %v969_v28 = vmul.f32 0.015625, %v876_v24 }
  0xb6   : > { %v1425_v29 = vrot.slane %v986_v27, %v1162_v11 }
  0xb7   : > { %v1341_v30 = vrot.slane %v969_v28, %v1155_v57  ;;  %v848_v32 = vpop.xlane.xlu1 %847 }
  0xb8   : > { %v814_v33 = vpop.xlane.xlu0 %813  ;;  %v1426_v34 = vsel %vm1164_vm2, %v1425_v29, %v1421_v14  ;;  %v955_v36 = vmul.f32 0.015625, %v848_v32 }
  0xb9   : > { %v1342_v35 = vsel %vm1157_vm1, %v1341_v30, %v1337_v15  ;;  %v938_v37 = vmul.f32 0.015625, %v814_v33  ;;  %vm1599_vm1 = vcmask 1024  }
  0xba   : > { %v1272_v38 = vrot.slane %v955_v36, %v1169_v31 }
  0xbb   : > { %v1163_v39 = vrot.slane %v938_v37, %v1162_v11  ;;  %v912_v41 = vpop.xlane.xlu1 %911 }
  0xbc   : > { %v878_v42 = vpop.xlane.xlu0 %877  ;;  %v1273_v43 = vsel %vm1171_vm3, %v1272_v38, %v1268_v25  ;;  %v987_v45 = vmul.f32 0.015625, %v912_v41  ;;  %v1187_v41 = vadd.s32 4294967240, %v2103_v17 }
  0xbd   : > { %v1165_v44 = vsel %vm1164_vm2, %v1163_v39, %v1158_v26  ;;  %v970_v46 = vmul.f32 0.015625, %v878_v42 }
  0xbe   : > { %v1430_v47 = vrot.slane %v987_v45, %v1169_v31  ;;  %v1201_v45 = vadd.s32 4294967224, %v2103_v17 }
  0xbf   : > { %v1346_v48 = vrot.slane %v970_v46, %v1162_v11  ;;  %v850_v50 = vpop.xlane.xlu1 %849 }
  0xc0   : > { %v816_v51 = vpop.xlane.xlu0 %815  ;;  %v1431_v52 = vsel %vm1171_vm3, %v1430_v47, %v1426_v34  ;;  %v956_v54 = vmul.f32 0.015625, %v850_v50  ;;  %v2205_v47 = vsub.s32 %v1187_v41, %v2107_v20 }
  0xc1   : > { %v1347_v53 = vsel %vm1164_vm2, %v1346_v48, %v1342_v35  ;;  %v939_v55 = vmul.f32 0.015625, %v816_v51  ;;  %v1215_v51 = vadd.s32 4294967208, %v2103_v17 }
  0xc2   : > { %v1277_v56 = vrot.slane %v956_v54, %v1176_v49 }
  0xc3   : > { %v1170_v57 = vrot.slane %v939_v55, %v1169_v31  ;;  %v914_v59 = vpop.xlane.xlu1 %913 }
  0xc4   : > { %v880_v60 = vpop.xlane.xlu0 %879  ;;  %v1278_v61 = vsel %vm1178_vm4, %v1277_v56, %v1273_v43  ;;  %v988_v63 = vmul.f32 0.015625, %v914_v59  ;;  %v2219_v59 = vsub.s32 %v1201_v45, %v2107_v20 }
  0xc5   : > { %v1172_v62 = vsel %vm1171_vm3, %v1170_v57, %v1165_v44  ;;  %v971_v0 = vmul.f32 0.015625, %v880_v60  ;;  %v1194_v44 = vadd.s32 4294967232, %v2103_v17  ;;  %v1236_v60 = vadd.s32 4294967184, %v2103_v17 }
  0xc6   : > { %v1435_v1 = vrot.slane %v988_v63, %v1176_v49 }
  0xc7   : > { %v1351_v2 = vrot.slane %v971_v0, %v1169_v31  ;;  %v852_v4 = vpop.xlane.xlu1 %851  ;;  %v2215_v57 = vsub.s32 %v1194_v44, %v2107_v20 }
  0xc8   : > { %v818_v5 = vpop.xlane.xlu0 %817  ;;  %v2168_v6 = vsel %vm1178_vm4, %v1435_v1, %v1431_v52  ;;  %v957_v8 = vmul.f32 0.015625, %v852_v4  ;;  %v1222_v52 = vadd.s32 4294967200, %v2103_v17 }
  0xc9   : > { %v1352_v7 = vsel %vm1171_vm3, %v1351_v2, %v1347_v53  ;;  %v940_v9 = vmul.f32 0.015625, %v818_v5  ;;  %v2230_v5 = vsub.s32 %v1215_v51, %v2107_v20 }
  0xca   : > { %v1282_v10 = vrot.slane %v957_v8, %v2165_v3 }
  0xcb   : > { %v1177_v11 = vrot.slane %v940_v9, %v1176_v49  ;;  %v916_v12 = vpop.xlane.xlu1 %915 }
  0xcc   : > { %v882_v13 = vpop.xlane.xlu0 %881  ;;  %v2173_v14 = vsel %vm1185_vm5, %v1282_v10, %v1278_v61  ;;  %v989_v46 = vmul.f32 0.015625, %v916_v12  ;;  %v1243_v61 = vadd.s32 4294967176, %v2103_v17  ;;  %v2242_v12 = vsub.s32 %v1229_v58, %v2107_v20 }
  0xcd   : > { %v2176_v15 = vsel %vm1178_vm4, %v1177_v11, %v1172_v62  ;;  %v972_v16 = vmul.f32 0.015625, %v882_v13 }
  0xce   : > { %v1440_v62 = vrot.slane %v989_v46, %v2165_v3 }
  0xcf   : > { %v1356_v18 = vrot.slane %v972_v16, %v1176_v49  ;;  %v854_v19 = vpop.xlane.xlu1 %853  ;;  %v1208_v49 = vadd.s32 4294967216, %v2103_v17 }
  0xd0   : > { %v820_v21 = vpop.xlane.xlu0 %819  ;;  %v958_v48 = vmul.f32 0.015625, %v854_v19  ;;  %v2248_v19 = vsub.s32 %v1243_v61, %v2107_v20 }
  0xd1   : > { %v2179_v22 = vsel %vm1178_vm4, %v1356_v18, %v1352_v7  ;;  %v941_v50 = vmul.f32 0.015625, %v820_v21  ;;  %v2226_v1 = vsub.s32 %v1208_v49, %v2107_v20  ;;  %v2233_v7 = vsub.s32 %v1222_v52, %v2107_v20 }
  0xd2   : > { %v1287_v63 = vrot.slane %v958_v48, %v2205_v47  ;;  %v2245_v18 = vsub.s32 %v1236_v60, %v2107_v20  ;;  %v1441_v21 = vsel %vm1185_vm5, %v1440_v62, %v2168_v6 }
  0xd3   : > { %v918_v23 = vpop.xlane.xlu1 %917  ;;  %v1184_v2 = vrot.slane %v941_v50, %v2165_v3 }
  0xd4   : > { %v884_v24 = vpop.xlane.xlu0 %883  ;;  %v990_v55 = vmul.f32 0.015625, %v918_v23  ;;  %v1288_v23 = vsel %vm1192_vm6, %v1287_v63, %v2173_v14 }
  0xd5   : > { %v973_v56 = vmul.f32 0.015625, %v884_v24 }
  0xd6   : > { %v1445_v9 = vrot.slane %v990_v55, %v2205_v47 }
  0xd7   : > { %v856_v25 = vpop.xlane.xlu1 %855  ;;  %v1361_v10 = vrot.slane %v973_v56, %v2165_v3 }
  0xd8   : > { %v822_v26 = vpop.xlane.xlu0 %821  ;;  %v959_v0 = vmul.f32 0.015625, %v856_v25  ;;  %v1186_v25 = vsel %vm1185_vm5, %v1184_v2, %v2176_v15  ;;  %v1446_v44 = vsel %vm1192_vm6, %v1445_v9, %v1441_v21 }
  0xd9   : > { %v942_v4 = vmul.f32 0.015625, %v822_v26  ;;  %v1362_v6 = vsel %vm1185_vm5, %v1361_v10, %v2179_v22 }
  0xda   : > { %v1292_v3 = vrot.slane %v959_v0, %v2215_v57 }
  0xdb   : > { %v920_v27 = vpop.xlane.xlu1 %919  ;;  %v1191_v26 = vrot.slane %v942_v4, %v2205_v47 }
  0xdc   : > { %v886_v28 = vpop.xlane.xlu0 %885  ;;  %v991_v11 = vmul.f32 0.015625, %v920_v27  ;;  %v1293_v46 = vsel %vm1199_vm7, %v1292_v3, %v1288_v23 }
  0xdd   : > { %v974_v13 = vmul.f32 0.015625, %v886_v28  ;;  %v1193_v50 = vsel %vm1192_vm6, %v1191_v26, %v1186_v25 }
  0xde   : > { %v1450_v14 = vrot.slane %v991_v11, %v2215_v57 }
  0xdf   : > { %v858_v29 = vpop.xlane.xlu1 %857  ;;  %v1366_v45 = vrot.slane %v974_v13, %v2205_v47 }
  0xe0   : > { %v824_v30 = vpop.xlane.xlu0 %823  ;;  %v960_v16 = vmul.f32 0.015625, %v858_v29 }
  0xe1   : > { %v943_v24 = vmul.f32 0.015625, %v824_v30 }
  0xe2   : > { %v1297_v15 = vrot.slane %v960_v16, %v2219_v59 }
  0xe3   : > { %v922_v31 = vpop.xlane.xlu1 %921  ;;  %v1198_v48 = vrot.slane %v943_v24, %v2215_v57 }
  0xe4   : > { %v888_v32 = vpop.xlane.xlu0 %887  ;;  %v992_v27 = vmul.f32 0.015625, %v922_v31  ;;  %v1298_v58 = vsel %vm1206_vm8, %v1297_v15, %v1293_v46 }
  0xe5   : > { %v975_v28 = vmul.f32 0.015625, %v888_v32 }
  0xe7   : > { %v2181_v33 = vpop.xlane.xlu1 %859  ;;  %v1371_v47 = vrot.slane %v975_v28, %v2215_v57 }
  0xe8   : > { %v2183_v34 = vpop.xlane.xlu0 %825  ;;  %v961_v30 = vmul.f32 0.015625, %v2181_v33  ;;  %v1455_v33 = vrot.slane %v992_v27, %v2219_v59 }
  0xe9   : > { %v944_v31 = vmul.f32 0.015625, %v2183_v34 }
  0xea   : > { %v1302_v55 = vrot.slane %v961_v30, %v2226_v1 }
  0xeb   : > { %v2185_v35 = vpop.xlane.xlu1 %923  ;;  %v1205_v60 = vrot.slane %v944_v31, %v2219_v59 }
  0xec   : > { %v2187_v36 = vpop.xlane.xlu0 %889  ;;  %v993_v32 = vmul.f32 0.015625, %v2185_v35  ;;  %v1451_v35 = vsel %vm1199_vm7, %v1450_v14, %v1446_v44  ;;  %v1303_v10 = vsel %vm1213_vm9, %v1302_v55, %v1298_v58 }
  0xed   : > { %v976_v49 = vmul.f32 0.015625, %v2187_v36 }
  0xee   : > { %v1460_v57 = vrot.slane %v993_v32, %v2226_v1 }
  0xef   : > { %v2189_v37 = vpop.xlane.xlu1 %861  ;;  %v1376_v61 = vrot.slane %v976_v49, %v2219_v59 }
  0xf0   : > { %v2191_v38 = vpop.xlane.xlu0 %827  ;;  %v962_v22 = vmul.f32 0.015625, %v2189_v37  ;;  %v1367_v37 = vsel %vm1192_vm6, %v1366_v45, %v1362_v6 }
  0xf1   : > { %v945_v51 = vmul.f32 0.015625, %v2191_v38  ;;  %v1200_v38 = vsel %vm1199_vm7, %v1198_v48, %v1193_v50 }
  0xf2   : > { %v1307_v62 = vrot.slane %v962_v22, %v2230_v5 }
  0xf3   : > { %v2193_v39 = vpop.xlane.xlu1 %925  ;;  %v1212_v0 = vrot.slane %v945_v51, %v2226_v1 }
  0xf4   : > { %v2195_v40 = vpop.xlane.xlu0 %891  ;;  %v994_v56 = vmul.f32 0.015625, %v2193_v39  ;;  %v1456_v39 = vsel %vm1206_vm8, %v1455_v33, %v1451_v35  ;;  %v1308_v3 = vsel %vm1220_vm10, %v1307_v62, %v1303_v10 }
  0xf5   : > { %v977_v36 = vmul.f32 0.015625, %v2195_v40  ;;  %v1372_v40 = vsel %vm1199_vm7, %v1371_v47, %v1367_v37  ;;  %v1461_v16 = vsel %vm1213_vm9, %v1460_v57, %v1456_v39 }
  0xf6   : > { %v1465_v11 = vrot.slane %v994_v56, %v2230_v5 }
  0xf7   : > { %v2198_v42 = vpop.xlane.xlu1 %863  ;;  %v1381_v59 = vrot.slane %v977_v36, %v2226_v1 }
  0xf8   : > { %v2200_v43 = vpop.xlane.xlu0 %829  ;;  %v963_v63 = vmul.f32 0.015625, %v2198_v42  ;;  %v1207_v42 = vsel %vm1206_vm8, %v1205_v60, %v1200_v38 }
  0xf9   : > { %v946_v2 = vmul.f32 0.015625, %v2200_v43  ;;  %v1377_v43 = vsel %vm1206_vm8, %v1376_v61, %v1372_v40 }
  0xfa   : > { %v1312_v24 = vrot.slane %v963_v63, %v2233_v7 }
  0xfb   : > { %v2210_v53 = vpop.xlane.xlu1 %927  ;;  %v1219_v1 = vrot.slane %v946_v2, %v2230_v5 }
  0xfc   : > { %v2212_v54 = vpop.xlane.xlu0 %893  ;;  %v995_v13 = vmul.f32 0.015625, %v2210_v53  ;;  %v1214_v53 = vsel %vm1213_vm9, %v1212_v0, %v1207_v42  ;;  %v1313_v31 = vsel %vm1227_vm11, %v1312_v24, %v1308_v3  ;;  %v1071_v3 = vsub.s32 1, %v2107_v20 }
  0xfd   : > { %v978_v21 = vmul.f32 0.015625, %v2212_v54  ;;  %v1466_v54 = vsel %vm1220_vm10, %v1465_v11, %v1461_v16  ;;  %v1221_v49 = vsel %vm1220_vm10, %v1219_v1, %v1214_v53 }
  0xfe   : > { %v1470_v6 = vrot.slane %v995_v13, %v2233_v7 }
  0xff   : > { %v2235_v8 = vpop.xlane.xlu1 %865  ;;  %v1386_v30 = vrot.slane %v978_v21, %v2230_v5 }
 0x100   : > { %v2237_v17 = vpop.xlane.xlu0 %831  ;;  %v964_v23 = vmul.f32 0.015625, %v2235_v8  ;;  %v1382_v8 = vsel %vm1213_vm9, %v1381_v59, %v1377_v43  ;;  %v1471_v51 = vsel %vm1227_vm11, %v1470_v6, %v1466_v54  ;;  %v1063_v43 = vld [vmem:[%s333_s8] sm:$0x3] }
 0x101   : > { %v947_v45 = vmul.f32 0.015625, %v2237_v17  ;;  %v1387_v35 = vsel %vm1220_vm10, %v1386_v30, %v1382_v8  ;;  %v1072_v53 = vrot.slane %v1063_v43, %v1071_v3 }
 0x103   : > { %v930_v29 = vpop.xlane.xlu1 %929 }
 0x104   : > { %v2258_v41 = vpop.xlane.xlu0 %895  ;;  %v996_v25 = vmul.f32 0.015625, %v930_v29  ;;  %v1317_v29 = vrot.slane %v964_v23, %v2242_v12 }
 0x105   : > { %v979_v15 = vmul.f32 0.015625, %v2258_v41 }
 0x106   : > { %v1475_v32 = vrot.slane %v996_v25, %v2242_v12  ;;  %v1318_v56 = vsel %vm1234_vm12, %v1317_v29, %v1313_v31  ;;  %v1565_v25 = vld [vmem:[%s337_s11] sm:$0x3] }
 0x107   : > { %v868_v34 = vpop.xlane.xlu1 %867  ;;  %v1391_v55 = vrot.slane %v979_v15, %v2233_v7  ;;  %v1574_v8 = vrot.slane %v1565_v25, %v1071_v3 }
 0x108   : > { %v834_v52 = vpop.xlane.xlu0 %833  ;;  %v965_v26 = vmul.f32 0.015625, %v868_v34  ;;  %v1476_v60 = vsel %vm1234_vm12, %v1475_v32, %v1471_v51 }
 0x109   : > { %v948_v46 = vmul.f32 0.015625, %v834_v52  ;;  %v1226_v52 = vrot.slane %v947_v45, %v2233_v7 }
 0x10a   : > { %v1322_v22 = vrot.slane %v965_v26, %v2245_v18 }
 0x10b   : > { %v932_v4 = vpop.xlane.xlu1 %931  ;;  %v1233_v36 = vrot.slane %v948_v46, %v2242_v12  ;;  %v1228_v2 = vsel %vm1227_vm11, %v1226_v52, %v1221_v49 }
 0x10c   : > { %v898_v9 = vpop.xlane.xlu0 %897  ;;  %v997_v27 = vmul.f32 0.015625, %v932_v4  ;;  %v1323_v63 = vsel %vm1241_vm13, %v1322_v22, %v1318_v56  ;;  %v1392_v4 = vsel %vm1227_vm11, %v1391_v55, %v1387_v35 }
 0x10d   : > { %v980_v48 = vmul.f32 0.015625, %v898_v9 }
 0x10e   : > { %v1480_v50 = vrot.slane %v997_v27, %v2245_v18 }
 0x10f   : > { %v870_v28 = vpop.xlane.xlu1 %869  ;;  %v1396_v37 = vrot.slane %v980_v48, %v2242_v12 }
 0x110   : > { %v836_v44 = vpop.xlane.xlu0 %835  ;;  %v966_v14 = vmul.f32 0.015625, %v870_v28  ;;  %v1481_v7 = vsel %vm1241_vm13, %v1480_v50, %v1476_v60 }
 0x111   : > { %v949_v33 = vmul.f32 0.015625, %v836_v44  ;;  %v1397_v10 = vsel %vm1234_vm12, %v1396_v37, %v1392_v4 }
 0x112   : > { %v1327_v17 = vrot.slane %v966_v14, %v2248_v19 }
 0x113   : > { %v934_v5 = vpop.xlane.xlu1 %933  ;;  %v1240_v57 = vrot.slane %v949_v33, %v2245_v18 }
 0x114   : > { %v900_v47 = vpop.xlane.xlu0 %899  ;;  %v998_v41 = vmul.f32 0.015625, %v934_v5  ;;  %v1328_v0 = vsel %vm1248_vm14, %v1327_v17, %v1323_v63 }
 0x115   : > { %v981_v34 = vmul.f32 0.015625, %v900_v47 }
 0x116   : > { %v1485_v58 = vrot.slane %v998_v41, %v2248_v19 }
 0x117   : > { %v1401_v38 = vrot.slane %v981_v34, %v2245_v18  ;;  %v902_v61 = vpop.xlane.xlu1 %901  ;;  %v1235_v18 = vsel %vm1234_vm12, %v1233_v36, %v1228_v2 }
 0x118   : > { %v838_v62 = vpop.xlane.xlu0 %837  ;;  %v982_v39 = vmul.f32 0.015625, %v902_v61  ;;  %v1486_v12 = vsel %vm1248_vm14, %v1485_v58, %v1481_v7  ;;  %v1242_v13 = vsel %vm1241_vm13, %v1240_v57, %v1235_v18 }
 0x119   : > { %v950_v40 = vmul.f32 0.015625, %v838_v62  ;;  %v1489_v9 = vsel %vm1487_vm15, %v1486_v12, %v1328_v0  ;;  %v1402_v42 = vsel %vm1241_vm13, %v1401_v38, %v1397_v10 }
 0x11a   : > { %v1406_v11 = vrot.slane %v982_v39, %v2248_v19  ;;  %1556 = vmatprep.mubr.f32.mxu0 %v1489_v9 }
 0x11b   : > { %v1247_v59 = vrot.slane %v950_v40, %v2248_v19  ;;  %v1067_v19 = vsub.s32 0, %v2107_v20  ;;  %v1744_v20 = vld [vmem:[%s340_s14] ss:$0 sm:$0xff] }
 0x11c   : > { %v1407_v21 = vsel %vm1248_vm14, %v1406_v11, %v1402_v42 }
 0x11d   : > { %v1249_v16 = vsel %vm1248_vm14, %v1247_v59, %v1242_v13  ;;  %v1068_v24 = vrot.slane %v1063_v43, %v1067_v19  ;;  %v1570_v27 = vrot.slane %v1565_v25, %v1067_v19 }
 0x11e   : > { %v1488_v23 = vsel %vm1487_vm15, %v1407_v21, %v1249_v16 }
 0x11f   : > { %1557 = vmatmul.mubr.f32.vlgmr.msra.gmra.mxu0 %v1488_v23 }
 0x1df   : > { %v1558_v1 = vpop.f32.mrf.mxu0 }
 0x1e0   : > { %v1559_v26 = vadd.f32 %v1558_v1, %v1068_v24 }
 0x1e1   : > { %v1560_v28 = vpop.f32.mrf.mxu0 }
 0x1e2   : > { %v1563_v44 = vmax.f32 %v1559_v26, 0.0  ;;  %v1561_v54 = vadd.f32 %v1560_v28, %v1072_v53 }
 0x1e4   : > { %v1577_v6 = vmul.f32 %v1570_v27, %v1563_v44  ;;  %v1564_v14 = vmax.f32 %v1561_v54, 0.0 }
 0x1e6   : > { %v1578_v30 = vmul.f32 %v1574_v8, %v1564_v14  ;;  %v1580_v29 = vsel %vm1579_vm0, %v1577_v6, 0.0 }
 0x1e8   : > { %v1581_v45 = vsel %vm1579_vm0, %v1578_v30, 0.0 }
 0x1e9   : > { %v1582_v15 = vadd.f32 %v1581_v45, %v1580_v29 }
 0x1eb   : > { %1583 = vadd.xlane.f32.xlu0 %v1582_v15 }
 0x274   : > { %v1584_v31 = vpop.xlane.xlu0 %1583 }
 0x275   : > { %v1592_v32 = vadd.f32 %v1744_v20, %v1584_v31 }
 0x277   : > { %v1745_v46 = vmul.f32 -1.442695, %v1592_v32 }
 0x279   : > { %1933 = vpow2.f32 %v1745_v46 }
 0x286   : > { %v1934_v48 = vpop.eup %1933 }
 0x287   : > { %v1596_v49 = vadd.f32 1.0, %v1934_v48 }
 0x289   : > { %1935 = vrcp.f32 %v1596_v49 }
 0x296   : > { %v1936_v22 = vpop.eup %1935 }
 0x297   : > { %1600 = vst.msk [vmem:[%s347_s17] sm:$0x3] %vm1599_vm1, %v1936_v22 }
 0x298 PF: > { %s15_s20 = sadd.s32 1, %s1959_s20   ;;  %s2382_s18 = smov %s1955_s19 }
 0x299   : > { %p12_p5 = scmp.ge.s32.totalorder %s15_s20, 6   ;;  %s2383_s19 = smov %s2385_s21 }
 0x29b   :  { %14 = sbr.rel (!%p12_p5) target bundleno = 2 (0x2), region = 94 }

</bundles_post_ra>
